<compile_context>
chip_gen: v7x
topology: tpu7x:2x2x1
jax: 0.10.0
libtpu: 0.0.40
codegen_flags: <defaults>
</compile_context>

<pallas_src>
import functools

import jax
import jax.numpy as jnp
from jax.experimental import pallas as pl
from jax.experimental.pallas import tpu as pltpu


# ---------------------------------------------------------------------------
# In-kernel math helpers
# ---------------------------------------------------------------------------
def _erf(x):
    # Abramowitz & Stegun 7.1.26 polynomial erf, |abs err| <= 1.5e-7.
    # exp() goes to the EUP; the Horner polynomial is cheap VPU mul/add.
    a1, a2, a3, a4, a5 = (0.254829592, -0.284496736, 1.421413741,
                          -1.453152027, 1.061405429)
    p = 0.3275911
    s = jnp.where(x >= 0.0, 1.0, -1.0)
    ax = jnp.abs(x)
    t = 1.0 / (1.0 + p * ax)
    poly = ((((a5 * t + a4) * t + a3) * t + a2) * t + a1) * t
    return s * (1.0 - poly * jnp.exp(-ax * ax))


def _gelu_exact(x):
    # nn.GELU() default in PyTorch is the exact (erf-based) GELU.
    return 0.5 * x * (1.0 + _erf(x * 0.7071067811865476))


# ---------------------------------------------------------------------------
# Fused kernel: MLP gate -> softmax -> top-1 mask -> normalize
# Transposed layout: rows = features/experts (sublanes), cols = tokens (lanes).
# ---------------------------------------------------------------------------
def switch_gate_kernel(xt_ref, w1_ref, b1_ref, w2_ref, b2_ref, w3_ref, b3_ref,
                       out_ref, denom_ref, *, num_experts, capacity, epsilon,
                       tile_tokens, num_tiles):
    i = pl.program_id(0)

    xt = xt_ref[...]                                                 # (dim, t)

    # 3-layer gate MLP on the MXU (weights in nn.Linear (out,in) layout).
    h = jnp.dot(w1_ref[...], xt, preferred_element_type=jnp.float32) + b1_ref[...]
    h = _gelu_exact(h)                                               # (hid, t)
    h = jnp.dot(w2_ref[...], h, preferred_element_type=jnp.float32) + b2_ref[...]
    h = _gelu_exact(h)                                               # (dim, t)
    logits = (jnp.dot(w3_ref[...], h, preferred_element_type=jnp.float32)
              + b3_ref[...])                                         # (E, t)

    # Softmax over experts (sublane axis).  Divide uses the EUP approximate
    # reciprocal; it is a per-token monotone scale, so top-1 is unchanged.
    m = jnp.max(logits, axis=0, keepdims=True)
    e = jnp.exp(logits - m)
    gate = e * pl.reciprocal(jnp.sum(e, axis=0, keepdims=True), approx=True)

    # Top-1 one-hot mask (first index of the max, same as torch.topk(1)).
    row = jax.lax.broadcasted_iota(jnp.int32, gate.shape, 0)         # expert id
    top = jnp.max(gate, axis=0, keepdims=True)
    arg = jnp.min(jnp.where(gate == top, row, num_experts),
                  axis=0, keepdims=True)
    masked = gate * (row == arg).astype(gate.dtype)                  # (E, t)

    # Per-tile partial denominator (per-expert sum over this tile's tokens).
    part = jnp.sum(masked, axis=1, keepdims=True)                    # (E, 1)

    if num_tiles == 1:
        # Fully fused single-tile path: normalize in registers, single store,
        # single HBM writeback, no VMEM read-back.
        scale = (1.0 / (part + epsilon)) * capacity                  # exact, (E,1)
        out_ref[...] = masked * scale
    else:
        # Write this tile's masked scores into the VMEM-resident (E, N) output
        # block (constant out index_map -> one HBM writeback at the very end).
        col0 = pl.multiple_of(i * tile_tokens, tile_tokens)
        out_ref[:, pl.ds(col0, tile_tokens)] = masked

        @pl.when(i == 0)
        def _():
            denom_ref[...] = part

        @pl.when(i > 0)
        def _():
            denom_ref[...] += part

        # Epilogue on the last tile: normalize + capacity scale in place while
        # the output block is still resident in VMEM.
        @pl.when(i == num_tiles - 1)
        def _():
            scale = (1.0 / (denom_ref[...] + epsilon)) * capacity    # (E, 1)
            out_ref[...] = out_ref[...] * scale


# ---------------------------------------------------------------------------
# Wrapper
# ---------------------------------------------------------------------------
def switch_gate_forward(x, params, *, num_experts, capacity_factor=1.0,
                        epsilon=1e-6, tile_tokens=None):
    """Pallas SwitchGate forward.  Returns (gate_scores, None) like the module.

    `params` use PyTorch nn.Linear layouts:
      w1 (dim//2, dim), b1 (dim//2,), w2 (dim, dim//2), b2 (dim,),
      w3 (num_experts, dim), b3 (num_experts,)
    """
    # TODO(synk): use_aux_loss=True auxiliary load-balancing loss branch not
    # implemented (the module's default path returns (gate_scores, None)).
    n, dim = x.shape
    hid = dim // 2
    w1, b1, w2, b2, w3, b3 = params
    capacity = float(int(capacity_factor * n))       # static, baked in

    if tile_tokens is None:
        tile_tokens = n if n <= 1024 else 512        # big tiles; toy N -> 1 step
    assert n % tile_tokens == 0
    num_tiles = n // tile_tokens
    if num_tiles > 1:
        # lane-axis stores into the resident output block must be 128-aligned
        assert tile_tokens % 128 == 0

    # Layout plumbing (plain XLA, outside the kernel): tokens on the lane axis
    # so every in-kernel tensor / store is lane-dense.
    xt = x.T                                         # (dim, n)
    b1c = b1.reshape(hid, 1)
    b2c = b2.reshape(dim, 1)
    b3c = b3.reshape(num_experts, 1)

    kernel = functools.partial(
        switch_gate_kernel, num_experts=num_experts, capacity=capacity,
        epsilon=float(epsilon), tile_tokens=tile_tokens, num_tiles=num_tiles)

    gate_t = pl.pallas_call(
        kernel,
        out_shape=jax.ShapeDtypeStruct((num_experts, n), jnp.float32),
        grid_spec=pltpu.PrefetchScalarGridSpec(
            num_scalar_prefetch=0,
            grid=(num_tiles,),
            in_specs=[
                pl.BlockSpec((dim, tile_tokens), lambda i: (0, i)),   # x^T tile
                # Weights/biases: constant index_map -> fetched once, resident.
                # At realistic dims add pipeline_mode=pl.Buffered(1) and/or
                # bf16 casts so resident weights fit v7x's 64 MiB VMEM.
                pl.BlockSpec((hid, dim), lambda i: (0, 0)),           # w1
                pl.BlockSpec((hid, 1), lambda i: (0, 0)),             # b1
                pl.BlockSpec((dim, hid), lambda i: (0, 0)),           # w2
                pl.BlockSpec((dim, 1), lambda i: (0, 0)),             # b2
                pl.BlockSpec((num_experts, dim), lambda i: (0, 0)),   # w3
                pl.BlockSpec((num_experts, 1), lambda i: (0, 0)),     # b3
            ],
            # Single VMEM-resident output block, written back to HBM once.
            out_specs=pl.BlockSpec((num_experts, n), lambda i: (0, 0)),
            scratch_shapes=[pltpu.VMEM((num_experts, 1), jnp.float32)],
        ),
        compiler_params=pltpu.CompilerParams(
            # Must be sequential: the epilogue needs the global per-expert
            # denominator accumulated across every token tile.
            dimension_semantics=("arbitrary",)),
    )(xt, w1, b1c, w2, b2c, w3, b3c)

    return gate_t.T, None                            # (N, E), aux=None


# ---------------------------------------------------------------------------
# Pure-JAX reference (for sanity check)
# ---------------------------------------------------------------------------
def switch_gate_reference(x, params, *, num_experts, capacity_factor=1.0,
                          epsilon=1e-6):
    w1, b1, w2, b2, w3, b3 = params
    h = jax.nn.gelu(x @ w1.T + b1, approximate=False)
    h = jax.nn.gelu(h @ w2.T + b2, approximate=False)
    logits = h @ w3.T + b3
    gate = jax.nn.softmax(logits, axis=-1)
    capacity = int(capacity_factor * x.shape[0])
    idx = jnp.argmax(gate, axis=-1)
    mask = jax.nn.one_hot(idx, num_experts, dtype=gate.dtype)
    masked = gate * mask
    denom = masked.sum(0, keepdims=True) + epsilon
    return masked / denom * capacity


# ---------------------------------------------------------------------------
# Main
# ---------------------------------------------------------------------------
if __name__ == "__main__":
    N, DIM, NUM_EXPERTS = 64, 32, 8          # tokens, feature dim, experts
    HID = DIM // 2

    key = jax.random.PRNGKey(0)
    kx, k1, k2, k3, k4, k5, k6 = jax.random.split(key, 7)

    x = jax.random.normal(kx, (N, DIM), dtype=jnp.float32)

    # Parameters in PyTorch nn.Linear layout: (out_features, in_features) / (out,)
    w1 = jax.random.normal(k1, (HID, DIM), jnp.float32) * (1.0 / jnp.sqrt(DIM))
    b1 = jax.random.normal(k2, (HID,), jnp.float32) * 0.01
    w2 = jax.random.normal(k3, (DIM, HID), jnp.float32) * (1.0 / jnp.sqrt(HID))
    b2 = jax.random.normal(k4, (DIM,), jnp.float32) * 0.01
    w3 = jax.random.normal(k5, (NUM_EXPERTS, DIM), jnp.float32) * (1.0 / jnp.sqrt(DIM))
    b3 = jax.random.normal(k6, (NUM_EXPERTS,), jnp.float32) * 0.01
    params = (w1, b1, w2, b2, w3, b3)

    gate_scores, aux = switch_gate_forward(
        x, params, num_experts=NUM_EXPERTS, capacity_factor=1.0, epsilon=1e-6)
    gate_scores = jax.block_until_ready(gate_scores)

    ref = switch_gate_reference(x, params, num_experts=NUM_EXPERTS,
                                capacity_factor=1.0, epsilon=1e-6)

    assert gate_scores.shape == (N, NUM_EXPERTS)
    assert aux is None
    assert bool(jnp.all(jnp.isfinite(gate_scores)))
    # Tolerance: A&S erf polynomial (~1.5e-7 abs) + EUP approximate reciprocal
    # in the softmax denominator vs. the exact-f32 reference.
    assert bool(jnp.allclose(gate_scores, ref, rtol=5e-3, atol=5e-3)), (
        float(jnp.max(jnp.abs(gate_scores - ref))))

    print("KERNEL_OK")
</pallas_src>

<mosaic_0001>
module attributes {stable_mosaic.version = 11 : i64} {
  func.func @switch_gate_kernel(%arg0: i32, %arg1: memref<32x64xf32, #tpu.memory_space<vmem>>, %arg2: memref<16x32xf32, #tpu.memory_space<vmem>>, %arg3: memref<16x1xf32, #tpu.memory_space<vmem>>, %arg4: memref<32x16xf32, #tpu.memory_space<vmem>>, %arg5: memref<32x1xf32, #tpu.memory_space<vmem>>, %arg6: memref<8x32xf32, #tpu.memory_space<vmem>>, %arg7: memref<8x1xf32, #tpu.memory_space<vmem>>, %arg8: memref<8x64xf32, #tpu.memory_space<vmem>>, %arg9: memref<8x1xf32, #tpu.memory_space<vmem>>) attributes {dimension_semantics = [#tpu.dimension_semantics<arbitrary>], iteration_bounds = array<i64: 1>, scalar_prefetch = 0 : i64, scratch_operands = 1 : i64, tpu.core_type = #tpu.core_type<tc>, window_params = [{transform_indices = @transform_0, window_bounds = array<i64: 32, 64>}, {pipeline_mode = #tpu.pipeline_mode<synchronous>, transform_indices = @transform_1, window_bounds = array<i64: 16, 32>}, {pipeline_mode = #tpu.pipeline_mode<synchronous>, transform_indices = @transform_2, window_bounds = array<i64: 16, 1>}, {pipeline_mode = #tpu.pipeline_mode<synchronous>, transform_indices = @transform_3, window_bounds = array<i64: 32, 16>}, {pipeline_mode = #tpu.pipeline_mode<synchronous>, transform_indices = @transform_4, window_bounds = array<i64: 32, 1>}, {pipeline_mode = #tpu.pipeline_mode<synchronous>, transform_indices = @transform_5, window_bounds = array<i64: 8, 32>}, {pipeline_mode = #tpu.pipeline_mode<synchronous>, transform_indices = @transform_6, window_bounds = array<i64: 8, 1>}, {pipeline_mode = #tpu.pipeline_mode<synchronous>, transform_indices = @transform_7, window_bounds = array<i64: 8, 64>}]} {
    %c0 = arith.constant 0 : index
    %c0_0 = arith.constant 0 : index
    %0 = vector.load %arg1[%c0, %c0_0] : memref<32x64xf32, #tpu.memory_space<vmem>>, vector<32x64xf32>
    %c0_1 = arith.constant 0 : index
    %c0_2 = arith.constant 0 : index
    %1 = vector.load %arg2[%c0_1, %c0_2] : memref<16x32xf32, #tpu.memory_space<vmem>>, vector<16x32xf32>
    %cst = arith.constant dense<0.000000e+00> : vector<16x64xf32>
    %2 = tpu.matmul %1, %0, %cst {dimension_numbers = #tpu.dot_dimension_numbers<[1], [0], [0], [1], [0, 0, 1, 1], [], []>} : vector<16x32xf32>, vector<32x64xf32>, vector<16x64xf32> -> vector<16x64xf32>
    %c0_3 = arith.constant 0 : index
    %c0_4 = arith.constant 0 : index
    %3 = vector.load %arg3[%c0_3, %c0_4] : memref<16x1xf32, #tpu.memory_space<vmem>>, vector<16x1xf32>
    %4 = vector.broadcast %3 : vector<16x1xf32> to vector<16x64xf32>
    %5 = arith.addf %2, %4 : vector<16x64xf32>
    %cst_5 = arith.constant 5.000000e-01 : f32
    %6 = vector.broadcast %cst_5 : f32 to vector<16x64xf32>
    %7 = arith.mulf %6, %5 : vector<16x64xf32>
    %cst_6 = arith.constant 0.707106769 : f32
    %8 = vector.broadcast %cst_6 : f32 to vector<16x64xf32>
    %9 = arith.mulf %5, %8 : vector<16x64xf32>
    %cst_7 = arith.constant 0.000000e+00 : f32
    %10 = vector.broadcast %cst_7 : f32 to vector<16x64xf32>
    %11 = arith.cmpf oge, %9, %10 : vector<16x64xf32>
    %cst_8 = arith.constant 1.000000e+00 : f32
    %cst_9 = arith.constant -1.000000e+00 : f32
    %12 = vector.broadcast %cst_8 : f32 to vector<16x64xf32>
    %13 = vector.broadcast %cst_9 : f32 to vector<16x64xf32>
    %14 = arith.select %11, %12, %13 : vector<16x64xi1>, vector<16x64xf32>
    %15 = math.absf %9 : vector<16x64xf32>
    %cst_10 = arith.constant 0.327591091 : f32
    %16 = vector.broadcast %cst_10 : f32 to vector<16x64xf32>
    %17 = arith.mulf %16, %15 : vector<16x64xf32>
    %cst_11 = arith.constant 1.000000e+00 : f32
    %18 = vector.broadcast %cst_11 : f32 to vector<16x64xf32>
    %19 = arith.addf %18, %17 : vector<16x64xf32>
    %cst_12 = arith.constant 1.000000e+00 : f32
    %20 = vector.broadcast %cst_12 : f32 to vector<16x64xf32>
    %21 = arith.divf %20, %19 : vector<16x64xf32>
    %cst_13 = arith.constant 1.06140542 : f32
    %22 = vector.broadcast %cst_13 : f32 to vector<16x64xf32>
    %23 = arith.mulf %22, %21 : vector<16x64xf32>
    %cst_14 = arith.constant -1.45315206 : f32
    %24 = vector.broadcast %cst_14 : f32 to vector<16x64xf32>
    %25 = arith.addf %23, %24 : vector<16x64xf32>
    %26 = arith.mulf %25, %21 : vector<16x64xf32>
    %cst_15 = arith.constant 1.42141378 : f32
    %27 = vector.broadcast %cst_15 : f32 to vector<16x64xf32>
    %28 = arith.addf %26, %27 : vector<16x64xf32>
    %29 = arith.mulf %28, %21 : vector<16x64xf32>
    %cst_16 = arith.constant -0.284496725 : f32
    %30 = vector.broadcast %cst_16 : f32 to vector<16x64xf32>
    %31 = arith.addf %29, %30 : vector<16x64xf32>
    %32 = arith.mulf %31, %21 : vector<16x64xf32>
    %cst_17 = arith.constant 0.254829586 : f32
    %33 = vector.broadcast %cst_17 : f32 to vector<16x64xf32>
    %34 = arith.addf %32, %33 : vector<16x64xf32>
    %35 = arith.mulf %34, %21 : vector<16x64xf32>
    %cst_18 = arith.constant 0.000000e+00 : f32
    %36 = vector.broadcast %cst_18 : f32 to vector<16x64xf32>
    %37 = arith.subf %36, %15 : vector<16x64xf32>
    %38 = arith.mulf %37, %15 : vector<16x64xf32>
    %39 = math.exp %38 : vector<16x64xf32>
    %40 = arith.mulf %35, %39 : vector<16x64xf32>
    %cst_19 = arith.constant 1.000000e+00 : f32
    %41 = vector.broadcast %cst_19 : f32 to vector<16x64xf32>
    %42 = arith.subf %41, %40 : vector<16x64xf32>
    %43 = arith.mulf %14, %42 : vector<16x64xf32>
    %cst_20 = arith.constant 1.000000e+00 : f32
    %44 = vector.broadcast %cst_20 : f32 to vector<16x64xf32>
    %45 = arith.addf %44, %43 : vector<16x64xf32>
    %46 = arith.mulf %7, %45 : vector<16x64xf32>
    %c0_21 = arith.constant 0 : index
    %c0_22 = arith.constant 0 : index
    %47 = vector.load %arg4[%c0_21, %c0_22] : memref<32x16xf32, #tpu.memory_space<vmem>>, vector<32x16xf32>
    %cst_23 = arith.constant dense<0.000000e+00> : vector<32x64xf32>
    %48 = tpu.matmul %47, %46, %cst_23 {dimension_numbers = #tpu.dot_dimension_numbers<[1], [0], [0], [1], [0, 0, 1, 1], [], []>} : vector<32x16xf32>, vector<16x64xf32>, vector<32x64xf32> -> vector<32x64xf32>
    %c0_24 = arith.constant 0 : index
    %c0_25 = arith.constant 0 : index
    %49 = vector.load %arg5[%c0_24, %c0_25] : memref<32x1xf32, #tpu.memory_space<vmem>>, vector<32x1xf32>
    %50 = vector.broadcast %49 : vector<32x1xf32> to vector<32x64xf32>
    %51 = arith.addf %48, %50 : vector<32x64xf32>
    %cst_26 = arith.constant 5.000000e-01 : f32
    %52 = vector.broadcast %cst_26 : f32 to vector<32x64xf32>
    %53 = arith.mulf %52, %51 : vector<32x64xf32>
    %cst_27 = arith.constant 0.707106769 : f32
    %54 = vector.broadcast %cst_27 : f32 to vector<32x64xf32>
    %55 = arith.mulf %51, %54 : vector<32x64xf32>
    %cst_28 = arith.constant 0.000000e+00 : f32
    %56 = vector.broadcast %cst_28 : f32 to vector<32x64xf32>
    %57 = arith.cmpf oge, %55, %56 : vector<32x64xf32>
    %cst_29 = arith.constant 1.000000e+00 : f32
    %cst_30 = arith.constant -1.000000e+00 : f32
    %58 = vector.broadcast %cst_29 : f32 to vector<32x64xf32>
    %59 = vector.broadcast %cst_30 : f32 to vector<32x64xf32>
    %60 = arith.select %57, %58, %59 : vector<32x64xi1>, vector<32x64xf32>
    %61 = math.absf %55 : vector<32x64xf32>
    %cst_31 = arith.constant 0.327591091 : f32
    %62 = vector.broadcast %cst_31 : f32 to vector<32x64xf32>
    %63 = arith.mulf %62, %61 : vector<32x64xf32>
    %cst_32 = arith.constant 1.000000e+00 : f32
    %64 = vector.broadcast %cst_32 : f32 to vector<32x64xf32>
    %65 = arith.addf %64, %63 : vector<32x64xf32>
    %cst_33 = arith.constant 1.000000e+00 : f32
    %66 = vector.broadcast %cst_33 : f32 to vector<32x64xf32>
    %67 = arith.divf %66, %65 : vector<32x64xf32>
    %cst_34 = arith.constant 1.06140542 : f32
    %68 = vector.broadcast %cst_34 : f32 to vector<32x64xf32>
    %69 = arith.mulf %68, %67 : vector<32x64xf32>
    %cst_35 = arith.constant -1.45315206 : f32
    %70 = vector.broadcast %cst_35 : f32 to vector<32x64xf32>
    %71 = arith.addf %69, %70 : vector<32x64xf32>
    %72 = arith.mulf %71, %67 : vector<32x64xf32>
    %cst_36 = arith.constant 1.42141378 : f32
    %73 = vector.broadcast %cst_36 : f32 to vector<32x64xf32>
    %74 = arith.addf %72, %73 : vector<32x64xf32>
    %75 = arith.mulf %74, %67 : vector<32x64xf32>
    %cst_37 = arith.constant -0.284496725 : f32
    %76 = vector.broadcast %cst_37 : f32 to vector<32x64xf32>
    %77 = arith.addf %75, %76 : vector<32x64xf32>
    %78 = arith.mulf %77, %67 : vector<32x64xf32>
    %cst_38 = arith.constant 0.254829586 : f32
    %79 = vector.broadcast %cst_38 : f32 to vector<32x64xf32>
    %80 = arith.addf %78, %79 : vector<32x64xf32>
    %81 = arith.mulf %80, %67 : vector<32x64xf32>
    %cst_39 = arith.constant 0.000000e+00 : f32
    %82 = vector.broadcast %cst_39 : f32 to vector<32x64xf32>
    %83 = arith.subf %82, %61 : vector<32x64xf32>
    %84 = arith.mulf %83, %61 : vector<32x64xf32>
    %85 = math.exp %84 : vector<32x64xf32>
    %86 = arith.mulf %81, %85 : vector<32x64xf32>
    %cst_40 = arith.constant 1.000000e+00 : f32
    %87 = vector.broadcast %cst_40 : f32 to vector<32x64xf32>
    %88 = arith.subf %87, %86 : vector<32x64xf32>
    %89 = arith.mulf %60, %88 : vector<32x64xf32>
    %cst_41 = arith.constant 1.000000e+00 : f32
    %90 = vector.broadcast %cst_41 : f32 to vector<32x64xf32>
    %91 = arith.addf %90, %89 : vector<32x64xf32>
    %92 = arith.mulf %53, %91 : vector<32x64xf32>
    %c0_42 = arith.constant 0 : index
    %c0_43 = arith.constant 0 : index
    %93 = vector.load %arg6[%c0_42, %c0_43] : memref<8x32xf32, #tpu.memory_space<vmem>>, vector<8x32xf32>
    %cst_44 = arith.constant dense<0.000000e+00> : vector<8x64xf32>
    %94 = tpu.matmul %93, %92, %cst_44 {dimension_numbers = #tpu.dot_dimension_numbers<[1], [0], [0], [1], [0, 0, 1, 1], [], []>} : vector<8x32xf32>, vector<32x64xf32>, vector<8x64xf32> -> vector<8x64xf32>
    %c0_45 = arith.constant 0 : index
    %c0_46 = arith.constant 0 : index
    %95 = vector.load %arg7[%c0_45, %c0_46] : memref<8x1xf32, #tpu.memory_space<vmem>>, vector<8x1xf32>
    %96 = vector.broadcast %95 : vector<8x1xf32> to vector<8x64xf32>
    %97 = arith.addf %94, %96 : vector<8x64xf32>
    %cst_47 = arith.constant dense<0xFF800000> : vector<64xf32>
    %98 = vector.multi_reduction <maximumf>, %97, %cst_47 [0] : vector<8x64xf32> to vector<64xf32>
    %99 = vector.shape_cast %98 : vector<64xf32> to vector<1x64xf32>
    %100 = vector.broadcast %99 : vector<1x64xf32> to vector<8x64xf32>
    %101 = arith.subf %97, %100 : vector<8x64xf32>
    %102 = math.exp %101 : vector<8x64xf32>
    %cst_48 = arith.constant dense<0.000000e+00> : vector<64xf32>
    %103 = vector.multi_reduction <add>, %102, %cst_48 [0] : vector<8x64xf32> to vector<64xf32>
    %104 = vector.shape_cast %103 : vector<64xf32> to vector<1x64xf32>
    %105 = tpu.reciprocal %104 {approx = true} : vector<1x64xf32> -> vector<1x64xf32>
    %106 = vector.broadcast %105 : vector<1x64xf32> to vector<8x64xf32>
    %107 = arith.mulf %102, %106 : vector<8x64xf32>
    %108 = tpu.iota {dimensions = array<i32: 0>} : vector<8x64xi32>
    %cst_49 = arith.constant dense<0xFF800000> : vector<64xf32>
    %109 = vector.multi_reduction <maximumf>, %107, %cst_49 [0] : vector<8x64xf32> to vector<64xf32>
    %110 = vector.shape_cast %109 : vector<64xf32> to vector<1x64xf32>
    %111 = vector.broadcast %110 : vector<1x64xf32> to vector<8x64xf32>
    %112 = arith.cmpf oeq, %107, %111 : vector<8x64xf32>
    %c8_i32 = arith.constant 8 : i32
    %113 = vector.broadcast %c8_i32 : i32 to vector<8x64xi32>
    %114 = arith.select %112, %108, %113 : vector<8x64xi1>, vector<8x64xi32>
    %cst_50 = arith.constant dense<2147483647> : vector<64xi32>
    %115 = vector.multi_reduction <minsi>, %114, %cst_50 [0] : vector<8x64xi32> to vector<64xi32>
    %116 = vector.shape_cast %115 : vector<64xi32> to vector<1x64xi32>
    %117 = vector.broadcast %116 : vector<1x64xi32> to vector<8x64xi32>
    %118 = arith.cmpi eq, %108, %117 : vector<8x64xi32>
    %119 = arith.extui %118 : vector<8x64xi1> to vector<8x64xi32>
    %120 = arith.sitofp %119 : vector<8x64xi32> to vector<8x64xf32>
    %121 = arith.mulf %107, %120 : vector<8x64xf32>
    %cst_51 = arith.constant dense<0.000000e+00> : vector<8xf32>
    %122 = vector.multi_reduction <add>, %121, %cst_51 [1] : vector<8x64xf32> to vector<8xf32>
    %123 = vector.shape_cast %122 : vector<8xf32> to vector<8x1xf32>
    %cst_52 = arith.constant 9.99999997E-7 : f32
    %124 = vector.broadcast %cst_52 : f32 to vector<8x1xf32>
    %125 = arith.addf %123, %124 : vector<8x1xf32>
    %cst_53 = arith.constant 1.000000e+00 : f32
    %126 = vector.broadcast %cst_53 : f32 to vector<8x1xf32>
    %127 = arith.divf %126, %125 : vector<8x1xf32>
    %cst_54 = arith.constant 6.400000e+01 : f32
    %128 = vector.broadcast %cst_54 : f32 to vector<8x1xf32>
    %129 = arith.mulf %127, %128 : vector<8x1xf32>
    %130 = vector.broadcast %129 : vector<8x1xf32> to vector<8x64xf32>
    %131 = arith.mulf %121, %130 : vector<8x64xf32>
    %c0_55 = arith.constant 0 : index
    %c0_56 = arith.constant 0 : index
    %132 = vector.load %arg8[%c0_55, %c0_56] : memref<8x64xf32, #tpu.memory_space<vmem>>, vector<8x64xf32>
    tpu.vector_store %arg8[%c0_55, %c0_56], %131 {strides = array<i32>} : memref<8x64xf32, #tpu.memory_space<vmem>>, vector<8x64xf32>,
    return
  }
  func.func @transform_0(%arg0: i32) -> (i32, i32) {
    %c0_i32 = arith.constant 0 : i32
    %c0_i32_0 = arith.constant 0 : i32
    return %c0_i32, %arg0 : i32, i32
  }
  func.func @transform_1(%arg0: i32) -> (i32, i32) {
    %c0_i32 = arith.constant 0 : i32
    %c0_i32_0 = arith.constant 0 : i32
    %c0_i32_1 = arith.constant 0 : i32
    return %c0_i32, %c0_i32_0 : i32, i32
  }
  func.func @transform_2(%arg0: i32) -> (i32, i32) {
    %c0_i32 = arith.constant 0 : i32
    %c0_i32_0 = arith.constant 0 : i32
    %c0_i32_1 = arith.constant 0 : i32
    return %c0_i32, %c0_i32_0 : i32, i32
  }
  func.func @transform_3(%arg0: i32) -> (i32, i32) {
    %c0_i32 = arith.constant 0 : i32
    %c0_i32_0 = arith.constant 0 : i32
    %c0_i32_1 = arith.constant 0 : i32
    return %c0_i32, %c0_i32_0 : i32, i32
  }
  func.func @transform_4(%arg0: i32) -> (i32, i32) {
    %c0_i32 = arith.constant 0 : i32
    %c0_i32_0 = arith.constant 0 : i32
    %c0_i32_1 = arith.constant 0 : i32
    return %c0_i32, %c0_i32_0 : i32, i32
  }
  func.func @transform_5(%arg0: i32) -> (i32, i32) {
    %c0_i32 = arith.constant 0 : i32
    %c0_i32_0 = arith.constant 0 : i32
    %c0_i32_1 = arith.constant 0 : i32
    return %c0_i32, %c0_i32_0 : i32, i32
  }
  func.func @transform_6(%arg0: i32) -> (i32, i32) {
    %c0_i32 = arith.constant 0 : i32
    %c0_i32_0 = arith.constant 0 : i32
    %c0_i32_1 = arith.constant 0 : i32
    return %c0_i32, %c0_i32_0 : i32, i32
  }
  func.func @transform_7(%arg0: i32) -> (i32, i32) {
    %c0_i32 = arith.constant 0 : i32
    %c0_i32_0 = arith.constant 0 : i32
    %c0_i32_1 = arith.constant 0 : i32
    return %c0_i32, %c0_i32_0 : i32, i32
  }
}

</mosaic_0001>

<bundles_post_ra>
// kernel: tpu_custom_call.1
= control target key start
LH: loop header
LB: loop body
LE: loop exit
PB: predicated region body
PF: predicated region fallthrough
CT: control target
= control target key end

     0   :  { %vm45_vm0 = vcmask 261120   ;;  %v700_v6 = vmov 0   ;;  %s867_s0 = inlined_call_operand.vmem [shape: f32[32,64], index: 0, kind: input, shape index: {}]   ;;  %s868_s1 = inlined_call_operand.vmem [shape: f32[16,32], index: 1, kind: input, shape index: {}]   ;;  %s869_s2 = inlined_call_operand.vmem [shape: f32[16,1], index: 2, kind: input, shape index: {}]   ;;  %s870_s3 = inlined_call_operand.vmem [shape: f32[32,16], index: 3, kind: input, shape index: {}]   ;;  %s871_s4 = inlined_call_operand.vmem [shape: f32[32,1], index: 4, kind: input, shape index: {}]   ;;  %s872_s5 = inlined_call_operand.vmem [shape: f32[8,32], index: 5, kind: input, shape index: {}]   ;;  %s873_s6 = inlined_call_operand.vmem [shape: f32[8,1], index: 6, kind: input, shape index: {}]   ;;  %s874_s7 = inlined_call_operand.hbm [shape: f32[8,64], index: 7, kind: output, shape index: {}]  }
   0x1   :  { %v27_v0 = vld [vmem:[%s867_s0] sm:$0xff]  ;;  %v28_v1 = vld [vmem:[%s867_s0 + $0x8] sm:$0xff]  ;;  %v29_v2 = vld [vmem:[%s867_s0 + $0x10] sm:$0xff]  ;;  %644 = vset.pattern.permute.xlu0 %v700_v6  ;;  %645 = vset.pattern.permute.xlu1 %v700_v6 }
   0x2   :  { %v620_v3 = vpack.c.bf16 %v28_v1, %v27_v0  ;;  %v30_v4 = vld [vmem:[%s867_s0 + $0x18] sm:$0xff]  ;;  %v31_v5 = vld [vmem:[%s868_s1] sm:$0xff] }
   0x3   :  { %v624_v7 = vpack.c.bf16 %v30_v4, %v29_v2  ;;  %596 = vmatprep.mubr.msk.f32.mxu0 %vm45_vm0, %v31_v5  ;;  %v33_v8 = vld [vmem:[%s869_s2] sm:$0xff] }
   0x4   :  { %621 = vmatprep.subr.bf16.mxu0 %v620_v3  ;;  %37 = vperm.xlu0 %644, %v33_v8  }
   0x5   :  { %12 = vsyncpa [#allocation4], 0  ;;  %623 = vmatpush3.bf16.msra.mxu0 %v620_v3  ;;  %v34_v9 = vld [vmem:[%s869_s2 + $0x8] sm:$0xff]  ;;  %v187_v11 = vld [vmem:[%s871_s4 + $0x10] sm:$0xff]  ;;  %vm209_vm1 = vcmask 130048   ;;  %v701_v62 = vmov -1.0  }
   0x6   :  { %625 = vmatprep.subr.bf16.mxu0 %v624_v7  ;;  %v32_v10 = vld [vmem:[%s868_s1 + $0x8] sm:$0xff]  ;;  %v416_v12 = vld [vmem:[%s873_s6] sm:$0xff]  ;;  %v188_v16 = vld [vmem:[%s871_s4 + $0x18] sm:$0xff]  ;;  %vm703_vm4 = vmmov 0   ;;  %vm495_vm9 = vcmask 523264  }
   0x7   :  { %v181_v13 = vld [vmem:[%s870_s3] sm:$0xff]  ;;  %v186_v15 = vld [vmem:[%s871_s4 + $0x8] sm:$0xff] }
   0x8   :  { %42 = vperm.xlu0 %644, %v34_v9   ;;  %603 = vmatprep.mubr.msk.f32.mxu1 %vm209_vm1, %v181_v13  ;;  %v185_v14 = vld [vmem:[%s871_s4] sm:$0xff]  ;;  %v184_v13 = vld [vmem:[%s870_s3 + $0x18] sm:$0xff] }
   0x9   :  { %627 = vmatpush3.bf16.msra.mxu0 %v624_v7  ;;  %191 = vperm.xlu1 %645, %v185_v14   ;;  %v702_v14 = vmov 0.0|0.0  }
   0xc   :  { %597 = vmatmul.mubr.msk.f32.vlgmr.msra.gmra.mrb[0].mxu0 %vm45_vm0, %v32_v10  ;;  %201 = vperm.xlu0 %644, %v187_v11   ;;  %v182_v11 = vld [vmem:[%s870_s3 + $0x8] sm:$0xff] }
   0xd   :  { %196 = vperm.xlu1 %645, %v186_v15   ;;  %v704_v15 = vmov 0.0  }
  0x10   :  { %419 = vperm.xlu0 %644, %v416_v12   ;;  %v183_v12 = vld [vmem:[%s870_s3 + $0x10] sm:$0xff] }
  0x11   :  { %206 = vperm.xlu1 %645, %v188_v16  }
  0x83   :  { %v38_v17 = vpop.permute.xlu0 %37 }
  0x87   :  { %v43_v18 = vpop.permute.xlu0 %42 }
  0x88   :  { %v192_v16 = vpop.permute.xlu1 %191 }
  0xdf   :  { %v598_v19 = vpop.f32.mrb[0].mxu0 }
  0xe0   :  { %v124_v20 = vadd.f32 %v598_v19, %v43_v18  ;;  %v118_v21 = vpop.f32.mrb[1].mxu0 }
  0xe1   :  { %v119_v22 = vadd.f32 %v118_v21, %v38_v17  ;;  %v197_v17 = vpop.permute.xlu1 %196 }
  0xe2   :  { %v130_v23 = vmul.f32 0.70710677, %v124_v20  ;;  %v128_v4 = vmul.f32 0.5, %v124_v20 }
  0xe3   :  { %v129_v24 = vmul.f32 0.70710677, %v119_v22  ;;  %v127_v6 = vmul.f32 0.5, %v119_v22 }
  0xe4   :  { %v136_v25 = vand.u32 2147483647, %v130_v23  ;;  %vm132_vm2 = vcmp.ge.f32.partialorder %v130_v23, 0.0 }
  0xe5   :  { %v135_v26 = vand.u32 2147483647, %v129_v24  ;;  %vm131_vm3 = vcmp.ge.f32.partialorder %v129_v24, 0.0  ;;  %v134_v63 = vsel %vm132_vm2, 1.0, %v701_v62  ;;  %v207_v23 = vpop.permute.xlu1 %206 }
  0xe6   :  { %v138_v27 = vmul.f32 0.3275911, %v136_v25  ;;  %v164_v31 = vsub.f32 0.0, %v136_v25  ;;  %v133_v1 = vsel %vm131_vm3, 1.0, %v701_v62 }
  0xe7   :  { %v137_v28 = vmul.f32 0.3275911, %v135_v26  ;;  %v163_v32 = vsub.f32 0.0, %v135_v26 }
  0xe8   :  { %v140_v29 = vadd.f32 1.0, %v138_v27  ;;  %v166_v34 = vmul.f32 %v164_v31, %v136_v25 }
  0xe9   :  { %v139_v30 = vadd.f32 1.0, %v137_v28  ;;  %v165_v36 = vmul.f32 %v163_v32, %v135_v26  ;;  %v202_v26 = vpop.permute.xlu0 %201 }
  0xea   :  { %646 = vrcp.f32 %v140_v29  ;;  %v169_v40 = vmul.f32 1.442695, %v166_v34 }
  0xeb   :  { %648 = vrcp.f32 %v139_v30  ;;  %v167_v42 = vmul.f32 1.442695, %v165_v36 }
  0xec   :  { %650 = vpow2.f32 %v169_v40 }
  0xed   :  { %652 = vpow2.f32 %v167_v42 }
  0xf4   :  { %v647_v33 = vpop.eup %646 }
  0xf5   :  { %v649_v35 = vpop.eup %648  ;;  %v146_v37 = vmul.f32 1.0614054, %v647_v33 }
  0xf6   :  { %v145_v38 = vmul.f32 1.0614054, %v649_v35  ;;  %v651_v56 = vpop.eup %650 }
  0xf7   :  { %v148_v39 = vadd.f32 -1.4531521, %v146_v37  ;;  %v653_v58 = vpop.eup %652 }
  0xf8   :  { %v147_v41 = vadd.f32 -1.4531521, %v145_v38 }
  0xf9   :  { %v150_v43 = vmul.f32 %v647_v33, %v148_v39 }
  0xfa   :  { %v149_v44 = vmul.f32 %v649_v35, %v147_v41 }
  0xfb   :  { %v152_v45 = vadd.f32 1.4214138, %v150_v43 }
  0xfc   :  { %v151_v46 = vadd.f32 1.4214138, %v149_v44 }
  0xfd   :  { %v154_v47 = vmul.f32 %v647_v33, %v152_v45 }
  0xfe   :  { %v153_v48 = vmul.f32 %v649_v35, %v151_v46 }
  0xff   :  { %v156_v49 = vadd.f32 -0.28449672, %v154_v47 }
 0x100   :  { %v155_v50 = vadd.f32 -0.28449672, %v153_v48 }
 0x101   :  { %v158_v51 = vmul.f32 %v647_v33, %v156_v49 }
 0x102   :  { %v157_v52 = vmul.f32 %v649_v35, %v155_v50 }
 0x103   :  { %v160_v53 = vadd.f32 0.2548296, %v158_v51 }
 0x104   :  { %v159_v54 = vadd.f32 0.2548296, %v157_v52 }
 0x105   :  { %v162_v55 = vmul.f32 %v647_v33, %v160_v53 }
 0x106   :  { %v161_v57 = vmul.f32 %v649_v35, %v159_v54 }
 0x107   :  { %v172_v59 = vmul.f32 %v651_v56, %v162_v55 }
 0x108   :  { %v171_v60 = vmul.f32 %v653_v58, %v161_v57 }
 0x109   :  { %v174_v61 = vsub.f32 1.0, %v172_v59 }
 0x10a   :  { %v173_v0 = vsub.f32 1.0, %v171_v60 }
 0x10b   :  { %v176_v2 = vmul.f32 %v174_v61, %v134_v63 }
 0x10c   :  { %v175_v3 = vmul.f32 %v173_v0, %v133_v1 }
 0x10d   :  { %v178_v5 = vadd.f32 1.0, %v176_v2 }
 0x10e   :  { %v177_v7 = vadd.f32 1.0, %v175_v3 }
 0x10f   :  { %v180_v8 = vmul.f32 %v178_v5, %v128_v4 }
 0x110   :  { %v179_v9 = vmul.f32 %v177_v7, %v127_v6 }
 0x112   :  { %v628_v10 = vpack.c.bf16 %v180_v8, %v179_v9 }
 0x114   :  { %629 = vmatprep.subr.bf16.mxu1 %v628_v10 }
 0x115   :  { %631 = vmatpush3.bf16.msra.mxu1 %v628_v10 }
 0x116   :  { %632 = vmatprep.subr.bf16.mxu1 %v702_v14 }
 0x118   :  { %604 = vmatmul.mubr.msk.f32.vlgmr.msra.gmra.mrb[0].mxu1 %vm209_vm1, %v182_v11 }
 0x119   :  { %606 = vmatprep.mubr.msk.f32.mxu1 %vm209_vm1, %v183_v12 }
 0x11c   :  { %607 = vmatmul.mubr.msk.f32.gmra.mrb[2].mxu1 %vm209_vm1, %v184_v13 }
 0x11d   :  { %617 = vmatprep.mubr.msk.f32.mxu1 %vm703_vm4, %v704_v15 }
 0x1eb   :  { %v605_v18 = vpop.f32.mrb[0].mxu1 }
 0x1ec   :  { %v807_v19 = vadd.f32 %v605_v18, %v197_v17  ;;  %v288_v20 = vpop.f32.mrb[1].mxu1 }
 0x1ed   :  { %v809_v21 = vadd.f32 %v288_v20, %v192_v16 }
 0x1ee   :  { %v812_v22 = vmul.f32 0.70710677, %v807_v19 }
 0x1ef   :  { %v815_v24 = vmul.f32 0.70710677, %v809_v21  ;;  %v608_v25 = vpop.f32.mrb[2].mxu1 }
 0x1f0   :  { %v324_v27 = vand.u32 2147483647, %v812_v22  ;;  %v818_v28 = vadd.f32 %v608_v25, %v207_v23  ;;  %v298_v29 = vpop.f32.mrb[3].mxu1  ;;  %vm316_vm5 = vcmp.ge.f32.partialorder %v812_v22, 0.0 }
 0x1f1   :  { %v323_v30 = vand.u32 2147483647, %v815_v24  ;;  %v821_v31 = vadd.f32 %v298_v29, %v202_v26  ;;  %vm315_vm6 = vcmp.ge.f32.partialorder %v815_v24, 0.0 }
 0x1f2   :  { %v328_v32 = vmul.f32 0.3275911, %v324_v27  ;;  %v824_v34 = vmul.f32 0.70710677, %v818_v28  ;;  %v380_v43 = vsub.f32 0.0, %v324_v27 }
 0x1f3   :  { %v327_v33 = vmul.f32 0.3275911, %v323_v30  ;;  %v827_v36 = vmul.f32 0.70710677, %v821_v31  ;;  %v379_v45 = vsub.f32 0.0, %v323_v30 }
 0x1f4   :  { %v332_v35 = vadd.f32 1.0, %v328_v32  ;;  %v326_v38 = vand.u32 2147483647, %v824_v34  ;;  %v384_v47 = vmul.f32 %v380_v43, %v324_v27  ;;  %vm318_vm7 = vcmp.ge.f32.partialorder %v824_v34, 0.0 }
 0x1f5   :  { %v331_v37 = vadd.f32 1.0, %v327_v33  ;;  %v325_v40 = vand.u32 2147483647, %v827_v36  ;;  %v383_v50 = vmul.f32 %v379_v45, %v323_v30  ;;  %v320_v45 = vsel %vm316_vm5, 1.0, %v701_v62 }
 0x1f6   :  { %654 = vrcp.f32 %v332_v35  ;;  %v330_v39 = vmul.f32 0.3275911, %v326_v38  ;;  %v382_v51 = vsub.f32 0.0, %v326_v38  ;;  %v389_v54 = vmul.f32 1.442695, %v384_v47 }
 0x1f7   :  { %656 = vrcp.f32 %v331_v37  ;;  %v329_v42 = vmul.f32 0.3275911, %v325_v40  ;;  %v381_v56 = vsub.f32 0.0, %v325_v40  ;;  %v387_v59 = vmul.f32 1.442695, %v383_v50 }
 0x1f8   :  { %v334_v41 = vadd.f32 1.0, %v330_v39  ;;  %v386_v60 = vmul.f32 %v382_v51, %v326_v38  ;;  %vm317_vm8 = vcmp.ge.f32.partialorder %v827_v36, 0.0 }
 0x1f9   :  { %v333_v44 = vadd.f32 1.0, %v329_v42  ;;  %v385_v4 = vmul.f32 %v381_v56, %v325_v40  ;;  %v307_v56 = vmul.f32 0.5, %v809_v21 }
 0x1fa   :  { %658 = vrcp.f32 %v334_v41  ;;  %v393_v6 = vmul.f32 1.442695, %v386_v60 }
 0x1fb   :  { %660 = vrcp.f32 %v333_v44  ;;  %v391_v16 = vmul.f32 1.442695, %v385_v4 }
 0x1fc   :  { %662 = vpow2.f32 %v389_v54 }
 0x1fd   :  { %664 = vpow2.f32 %v387_v59 }
 0x1fe   :  { %666 = vpow2.f32 %v393_v6 }
 0x1ff   :  { %668 = vpow2.f32 %v391_v16 }
 0x200   :  { %v655_v46 = vpop.eup %654 }
 0x201   :  { %v657_v48 = vpop.eup %656  ;;  %v344_v49 = vmul.f32 1.0614054, %v655_v46 }
 0x202   :  { %v343_v52 = vmul.f32 1.0614054, %v657_v48 }
 0x203   :  { %v348_v53 = vadd.f32 -1.4531521, %v344_v49 }
 0x204   :  { %v347_v55 = vadd.f32 -1.4531521, %v343_v52  ;;  %v659_v57 = vpop.eup %658 }
 0x205   :  { %v352_v58 = vmul.f32 %v655_v46, %v348_v53  ;;  %v346_v63 = vmul.f32 1.0614054, %v659_v57  ;;  %v661_v1 = vpop.eup %660  ;;  %v308_v53 = vmul.f32 0.5, %v807_v19  ;;  %v321_v19 = vsel %vm317_vm8, 1.0, %v701_v62 }
 0x206   :  { %v351_v61 = vmul.f32 %v657_v48, %v347_v55  ;;  %v345_v7 = vmul.f32 1.0614054, %v661_v1  ;;  %v663_v33 = vpop.eup %662 }
 0x207   :  { %v356_v0 = vadd.f32 1.4214138, %v352_v58  ;;  %v350_v3 = vadd.f32 -1.4531521, %v346_v63  ;;  %v665_v38 = vpop.eup %664 }
 0x208   :  { %v355_v2 = vadd.f32 1.4214138, %v351_v61  ;;  %v349_v11 = vadd.f32 -1.4531521, %v345_v7 }
 0x209   :  { %v360_v5 = vmul.f32 %v655_v46, %v356_v0  ;;  %v354_v9 = vmul.f32 %v659_v57, %v350_v3 }
 0x20a   :  { %v359_v8 = vmul.f32 %v657_v48, %v355_v2  ;;  %v353_v18 = vmul.f32 %v661_v1, %v349_v11 }
 0x20b   :  { %v364_v10 = vadd.f32 -0.28449672, %v360_v5  ;;  %v358_v13 = vadd.f32 1.4214138, %v354_v9  ;;  %v309_v5 = vmul.f32 0.5, %v821_v31 }
 0x20c   :  { %v363_v12 = vadd.f32 -0.28449672, %v359_v8  ;;  %v357_v26 = vadd.f32 1.4214138, %v353_v18  ;;  %v415_v8 = vld [vmem:[%s872_s5] sm:$0xff]  ;;  %s705_s5 = smov [#allocation3]  }
 0x20d   :  { %v368_v17 = vmul.f32 %v655_v46, %v364_v10  ;;  %v362_v23 = vmul.f32 %v659_v57, %v358_v13  ;;  %s555_s8 = sshll.u32 %s705_s5, 4  ;;  %s556_s8 = int_to_ptr.vmem [resolvable:$true] %s555_s8 }
 0x20e   :  { %v367_v20 = vmul.f32 %v657_v48, %v363_v12  ;;  %v361_v32 = vmul.f32 %v661_v1, %v357_v26  ;;  %s676_s9 = scalar_lea.vmem %s556_s8, 128  ;;  %p681_p1 = scmp.lt.s32.totalorder %s556_s8, %s556_s8 }
 0x20f   :  { %v372_v25 = vadd.f32 0.2548296, %v368_v17  ;;  %v366_v29 = vadd.f32 -0.28449672, %v362_v23  ;;  %p677_p0 = scmp.ne.s32.totalorder %s556_s8, %s676_s9  ;;  %p682_p2 = scmp.lt.s32.totalorder %s676_s9, %s676_s9 }
 0x210   :  { %v371_v27 = vadd.f32 0.2548296, %v367_v20  ;;  %v365_v40 = vadd.f32 -0.28449672, %v361_v32 }
 0x211   :  { %v376_v30 = vmul.f32 %v655_v46, %v372_v25  ;;  %v370_v37 = vmul.f32 %v659_v57, %v366_v29  ;;  %v667_v46 = vpop.eup %666  ;;  %p683_p3 = por %p682_p2, %p681_p1 }
 0x212   :  { %v375_v35 = vmul.f32 %v657_v48, %v371_v27  ;;  %v369_v44 = vmul.f32 %v661_v1, %v365_v40  ;;  %v319_v48 = vsel %vm315_vm6, 1.0, %v701_v62  ;;  %v669_v55 = vpop.eup %668 }
 0x213   :  { %v396_v39 = vmul.f32 %v663_v33, %v376_v30  ;;  %v374_v42 = vadd.f32 0.2548296, %v370_v37  ;;  %p684_p4 = pnand %p683_p3, %p677_p0 }
 0x214   :  { %v395_v41 = vmul.f32 %v665_v38, %v375_v35  ;;  %v373_v51 = vadd.f32 0.2548296, %v369_v44 }
 0x215   :  { %v400_v43 = vsub.f32 1.0, %v396_v39  ;;  %v378_v49 = vmul.f32 %v659_v57, %v374_v42  ;;  %v322_v57 = vsel %vm318_vm7, 1.0, %v701_v62  ;;  %v420_v62 = vpop.permute.xlu0 %419  ;;  %v515_v42 = vlaneseq }
 0x216   :  { %v399_v47 = vsub.f32 1.0, %v395_v41  ;;  %v377_v54 = vmul.f32 %v661_v1, %v373_v51  ;;  %v310_v1 = vmul.f32 0.5, %v818_v28 }
 0x217   :  { %v404_v50 = vmul.f32 %v400_v43, %v320_v45  ;;  %v398_v22 = vmul.f32 %v667_v46, %v378_v49  ;;  %v516_v45 = vshrl.u32 %v515_v42, 7 }
 0x218   :  { %v403_v52 = vmul.f32 %v399_v47, %v319_v48  ;;  %v397_v61 = vmul.f32 %v669_v55, %v377_v54 }
 0x219   :  { %v408_v24 = vadd.f32 1.0, %v404_v50  ;;  %v402_v59 = vsub.f32 1.0, %v398_v22 }
 0x21a   :  { %v407_v58 = vadd.f32 1.0, %v403_v52  ;;  %v401_v2 = vsub.f32 1.0, %v397_v61 }
 0x21b   :  { %v412_v60 = vmul.f32 %v408_v24, %v308_v53  ;;  %v406_v0 = vmul.f32 %v402_v59, %v322_v57 }
 0x21c   :  { %v411_v63 = vmul.f32 %v407_v58, %v307_v56  ;;  %v405_v4 = vmul.f32 %v401_v2, %v321_v19 }
 0x21d   :  { %v410_v3 = vadd.f32 1.0, %v406_v0 }
 0x21e   :  { %v633_v34 = vpack.c.bf16 %v412_v60, %v411_v63  ;;  %v409_v6 = vadd.f32 1.0, %v405_v4 }
 0x21f   :  { %v414_v21 = vmul.f32 %v410_v3, %v310_v1 }
 0x220   :  { %634 = vmatpush3.bf16.msra.mxu1 %v633_v34  ;;  %v413_v7 = vmul.f32 %v409_v6, %v309_v5 }
 0x221   :  { %635 = vmatprep.subr.bf16.mxu1 %v702_v14 }
 0x222   :  { %v636_v36 = vpack.c.bf16 %v414_v21, %v413_v7 }
 0x224   :  { %637 = vmatpush3.bf16.msra.mxu1 %v636_v36 }
 0x227   :  { %618 = vmatmul.mubr.msk.f32.vlgmr.msra.gmra.mrb[4].mxu1 %vm45_vm0, %v415_v8 }
 0x2fa   :  { %v491_v9 = vpop.f32.mrb[4].mxu1 }
 0x2fb   :  { %v492_v28 = vadd.f32 %v491_v9, %v420_v62  ;;  %v619_v10 = vpop.f32.mrb[5].mxu1 }
 0x2fd   :  { %v496_v11 = vsel %vm495_vm9, %v492_v28, -inf }
 0x2fe   :  { %v497_v31 = vrot.slane %v496_v11, 4 }
 0x300   :  { %v498_v12 = vmax.f32 %v496_v11, %v497_v31 }
 0x302   :  { %v499_v13 = vrot.slane %v498_v12, 2 }
 0x304   :  { %v500_v14 = vmax.f32 %v498_v12, %v499_v13 }
 0x306   :  { %v501_v16 = vrot.slane %v500_v14, 1 }
 0x308   :  { %v502_v17 = vmax.f32 %v500_v14, %v501_v16 }
 0x30a   :  { %v503_v18 = vsub.f32 %v492_v28, %v502_v17 }
 0x30c   :  { %v504_v20 = vmul.f32 1.442695, %v503_v18 }
 0x30e   :  { %670 = vpow2.f32 %v504_v20 }
 0x318   :  { %v671_v23 = vpop.eup %670 }
 0x319   :  { %v506_v25 = vsel %vm495_vm9, %v671_v23, 0.0 }
 0x31a   :  { %v507_v26 = vrot.slane %v506_v25, 4 }
 0x31c   :  { %v508_v27 = vadd.f32 %v507_v26, %v506_v25 }
 0x31e   :  { %v509_v29 = vrot.slane %v508_v27, 2 }
 0x320   :  { %v510_v30 = vadd.f32 %v509_v29, %v508_v27 }
 0x322   :  { %v511_v32 = vrot.slane %v510_v30, 1 }
 0x324   :  { %v512_v33 = vadd.f32 %v511_v32, %v510_v30 }
 0x326   :  { %672 = vrcp.f32 %v512_v33 }
 0x330   :  { %v673_v35 = vpop.eup %672 }
 0x331   :  { %v514_v37 = vmul.f32 %v673_v35, %v671_v23 }
 0x333   :  { %v517_v38 = vsel %vm495_vm9, %v514_v37, -inf }
 0x334   :  { %v518_v39 = vrot.slane %v517_v38, 4 }
 0x336   :  { %v519_v40 = vmax.f32 %v517_v38, %v518_v39 }
 0x338   :  { %v520_v41 = vrot.slane %v519_v40, 2 }
 0x33a   :  { %v521_v43 = vmax.f32 %v519_v40, %v520_v41 }
 0x33c   :  { %v522_v44 = vrot.slane %v521_v43, 1 }
 0x33e   :  { %v523_v47 = vmax.f32 %v521_v43, %v522_v44 }
 0x340   :  { %vm524_vm10 = vcmp.eq.f32.partialorder %v514_v37, %v523_v47 }
 0x341   :  { %v525_v49 = vsel %vm524_vm10, %v516_v45, 8 }
 0x342   :  { %v526_v46 = vsel %vm495_vm9, %v525_v49, 2147483647 }
 0x343   :  { %v527_v50 = vrot.slane %v526_v46, 4 }
 0x345   :  { %vm528_vm11 = vcmp.lt.s32.totalorder %v526_v46, %v527_v50 }
 0x346   :  { %v529_v48 = vsel %vm528_vm11, %v526_v46, %v527_v50 }
 0x347   :  { %v530_v51 = vrot.slane %v529_v48, 2 }
 0x349   :  { %vm531_vm12 = vcmp.lt.s32.totalorder %v529_v48, %v530_v51 }
 0x34a   :  { %v532_v52 = vsel %vm531_vm12, %v529_v48, %v530_v51 }
 0x34b   :  { %v533_v22 = vrot.slane %v532_v52, 1 }
 0x34d   :  { %vm534_vm13 = vcmp.lt.s32.totalorder %v532_v52, %v533_v22 }
 0x34e   :  { %v535_v53 = vsel %vm534_vm13, %v532_v52, %v533_v22 }
 0x34f   :  { %vm536_vm14 = vcmp.eq.s32.totalorder %v516_v45, %v535_v53 }
 0x350   :  { %v570_v24 = vsel %vm536_vm14, 1.0, %v704_v15 }
 0x351   :  { %v539_v54 = vmul.f32 %v570_v24, %v514_v37 }
 0x353   :  { %v540_v55 = vsel %vm495_vm9, %v539_v54, 0.0 }
 0x354   :  { %541 = vadd.xlane.f32.xlu1 %v540_v55 }
 0x3e1   :  { %v542_v56 = vpop.xlane.xlu1 %541 }
 0x3e2   :  { %v543_v58 = vadd.f32 1e-06, %v542_v56 }
 0x3e4   :  { %674 = vrcp.f32 %v543_v58 }
 0x3ee   :  { %v675_v59 = vpop.eup %674 }
 0x3ef   :  { %v546_v60 = vmul.f32 64.0, %v675_v59 }
 0x3f1   :  { %v547_v57 = vmul.f32 %v546_v60, %v539_v54 }
 0x3f3   :  { %548 = vst.msk [vmem:[#allocation3] sm:$0xff] %vm495_vm9, %v547_v57 }
 0x3f4   :  { %687 = shalt.err (!%p684_p4)
}
 0x3f5   :  { %s688_s12 = scalar_lea.hbm %s874_s7, 128 }
 0x3f6   :  { %p689_p5 = scmp.ne.s32.totalorder %s874_s7, %s688_s12  ;;  %p692_p6 = scmp.lt.u32.totalorder %s688_s12, %s874_s7 }
 0x3f8   :  { %p694_p7 = pnand %p692_p6, %p689_p5 }
 0x3fa   :  { %697 = shalt.err (!%p694_p7)
}
 0x3fb   :  { %558 = dma.vmem_to_hbm [thread:$0]  %s556_s8, 128, %s874_s7, [#allocation4]  }
 0x3fc   :  { %698 = dma.done.wait [#allocation4], 128  }
 0x3fd   :  { %699 = vsyncadd [#allocation4], 4294967168 }
 0x3fe   :  { %562 = vsyncpa [#allocation4], 1 }

</bundles_post_ra>
